<compile_context>
chip_gen: v5e
topology: v5e:2x2
jax: 0.10.0
libtpu: 0.0.40
codegen_flags: <defaults>
</compile_context>

<pallas_src>
import jax
import jax.numpy as jnp
from jax.experimental import pallas as pl
from jax.experimental.pallas import tpu as pltpu


def _pick_tile_n(N, D, C, vmem_budget_bytes):
    """Largest N-tile (multiple of 128, capped at 8192) whose working set fits the budget."""
    # per-row bytes: f32 feats double-buffer (8D) + masked f32 temp (4D) + bf16 cast (2D)
    #                + bf16/bool one-hot (3C) + label row (~8)
    per_row = 14 * D + 3 * C + 8
    fixed = 3 * C * D * 4 + 4 * C * 512 + 4096   # accumulators + output blocks + slack
    tn = (vmem_budget_bytes - fixed) // per_row
    tn = max(128, min(int(tn), 8192))
    return (tn // 128) * 128


def divergence_score(feats, pseudo_lbls, src_proto, src_proto_cov, *,
                     tile_n=None, vmem_budget_bytes=20 * 1024 * 1024):
    """feats: [N, D]; pseudo_lbls: [N] int; src_proto(_cov): [C, D]  ->  scalar f32 loss."""
    N, D = feats.shape
    C, Dp = src_proto.shape
    assert Dp == D and src_proto_cov.shape == (C, D)

    if tile_n is None:
        tile_n = _pick_tile_n(N, D, C, vmem_budget_bytes)

    if N <= tile_n:
        TN = N                      # single full-extent tile (block == array dim: always legal)
        num_tiles = 1
    else:
        TN = max(128, (tile_n // 128) * 128)   # lane / MXU-contraction aligned chunk
        num_tiles = pl.cdiv(N, TN)

    # Split the N stream across (up to) 2 shards; on v7x the leading "parallel" axis maps
    # the shards onto the two TensorCores, elsewhere it just iterates sequentially.
    num_shards = 2 if num_tiles >= 2 else 1
    tiles_per_shard = pl.cdiv(num_tiles, num_shards)
    total_tiles = num_shards * tiles_per_shard
    N_pad = total_tiles * TN
    last_block = num_tiles - 1      # last feats block whose start row is in-bounds
    needs_row_mask = (N_pad != N)

    # Labels are tiny: pad them to the full logical extent with -1 (=> all-zero one-hot).
    lbls = pseudo_lbls.astype(jnp.int32)
    if N_pad != N:
        lbls = jnp.pad(lbls, (0, N_pad - N), constant_values=-1)
    lbl2d = lbls.reshape(1, N_pad)

    def kernel(lbl_ref, feats_ref, sums_out_ref, counts_out_ref, sums_acc, counts_acc):
        s = pl.program_id(0)
        n = pl.program_id(1)

        # ---- init per-shard accumulators on the first N-tile ----------------------
        @pl.when(n == 0)
        def _init():
            sums_acc[...] = jnp.zeros_like(sums_acc)
            counts_acc[...] = jnp.zeros_like(counts_acc)

        lbl_row = lbl_ref[...]                             # (1, TN) int32
        tile = feats_ref[...]                              # (TN, D) caller dtype

        if needs_row_mask:
            # Zero rows past N: the ragged last tile (and fully out-of-range shard-tail
            # tiles) may contain unspecified data; 0 x NaN would poison the MXU otherwise.
            row0 = (s * tiles_per_shard + n) * TN
            row_ids = jax.lax.broadcasted_iota(jnp.int32, (TN, 1), 0) + row0
            tile = jnp.where(row_ids < N, tile, jnp.zeros_like(tile))

        tile_bf = tile.astype(jnp.bfloat16)                # in-kernel cast, hidden under DMA

        # One-hot label matrix: onehot[c, n] = 1 iff pseudo_lbls[n] == c (0/1 exact in bf16).
        class_ids = jax.lax.broadcasted_iota(jnp.int32, (C, TN), 0)
        onehot_bool = class_ids == lbl_row                 # (C, TN) bool
        onehot_bf = onehot_bool.astype(jnp.bfloat16)

        # MXU per-class feature sums with f32 accumulation; counts are VPU/XLU filler
        # hidden under the feats DMA.
        sums_acc[...] += jnp.dot(onehot_bf, tile_bf,
                                 preferred_element_type=jnp.float32)            # (C, D)
        counts_acc[...] += jnp.sum(onehot_bool.astype(jnp.float32),
                                   axis=1, keepdims=True)                        # (C, 1)

        # ---- emit this shard's partials on the last N-tile -------------------------
        @pl.when(n == pl.num_programs(1) - 1)
        def _finalize():
            sums_out_ref[0] = sums_acc[...]
            counts_out_ref[0] = counts_acc[...]

    if total_tiles == num_tiles:
        feats_index_map = lambda s, n: (s * tiles_per_shard + n, 0)
    else:
        # Shard-tail tiles whose logical start is past N are clamped onto the last
        # in-bounds block; the in-kernel row mask zeroes their contribution.
        feats_index_map = lambda s, n: (jnp.minimum(s * tiles_per_shard + n, last_block), 0)

    sums_p, counts_p = pl.pallas_call(
        kernel,
        out_shape=(
            jax.ShapeDtypeStruct((num_shards, C, D), jnp.float32),
            jax.ShapeDtypeStruct((num_shards, C, 1), jnp.float32),
        ),
        grid_spec=pltpu.PrefetchScalarGridSpec(
            num_scalar_prefetch=0,
            grid=(num_shards, tiles_per_shard),
            in_specs=[
                pl.BlockSpec((1, TN), lambda s, n: (0, s * tiles_per_shard + n)),  # labels
                pl.BlockSpec((TN, D), feats_index_map),                            # feats stream
            ],
            out_specs=(
                pl.BlockSpec((1, C, D), lambda s, n: (s, 0, 0)),   # per-shard class sums
                pl.BlockSpec((1, C, 1), lambda s, n: (s, 0, 0)),   # per-shard class counts
            ),
            scratch_shapes=[
                pltpu.VMEM((C, D), jnp.float32),
                pltpu.VMEM((C, 1), jnp.float32),
            ],
        ),
        compiler_params=pltpu.CompilerParams(
            dimension_semantics=("parallel", "arbitrary"),
            vmem_limit_bytes=40 * 1024 * 1024,   # > v5e's 16 MiB default, < v7x's 64 MiB physical
        ),
    )(lbl2d, feats)

    # ---- tiny O(C*D) f32 epilogue: combine per-core partials + GSS loss ---------------
    sums = jnp.sum(sums_p, axis=0)                          # (C, D)
    counts = jnp.sum(counts_p, axis=0)                      # (C, 1)
    present = (counts > 0.0).astype(jnp.float32)            # classes actually in the batch
    means = sums / jnp.maximum(counts, 1.0)
    proto = src_proto.astype(jnp.float32)
    cov = src_proto_cov.astype(jnp.float32)
    sq = (means - proto) ** 2 / (cov + 1e-6)
    total = jnp.sum(sq * present)
    return total / (jnp.sum(present) * jnp.float32(D))


def divergence_score_ref(feats, pseudo_lbls, src_proto, src_proto_cov):
    """Pure-JAX f32 reference mirroring the PyTorch module."""
    C, D = src_proto.shape
    onehot = (jnp.arange(C)[:, None] == pseudo_lbls[None, :]).astype(jnp.float32)
    counts = onehot.sum(axis=1, keepdims=True)
    sums = onehot @ feats.astype(jnp.float32)
    present = (counts > 0).astype(jnp.float32)
    means = sums / jnp.maximum(counts, 1.0)
    sq = (means - src_proto) ** 2 / (src_proto_cov + 1e-6)
    total = (sq.sum(axis=1, keepdims=True) * present).sum()
    return total / (present.sum() * D)


if __name__ == "__main__":
    key = jax.random.PRNGKey(0)

    # ---- small test: single full-extent tile, 1 shard ---------------------------------
    N, D, C = 16, 32, 8
    k1, k2, k3, k4 = jax.random.split(key, 4)
    feats = jax.random.normal(k1, (N, D), dtype=jnp.float32)
    pseudo_lbls = jax.random.randint(k2, (N,), 0, C, dtype=jnp.int32)
    src_proto = jax.random.normal(k3, (C, D), dtype=jnp.float32)
    src_proto_cov = jax.random.uniform(k4, (C, D), dtype=jnp.float32,
                                       minval=0.1, maxval=1.0)

    out = jax.block_until_ready(divergence_score(feats, pseudo_lbls, src_proto, src_proto_cov))
    feats_q = feats.astype(jnp.bfloat16).astype(jnp.float32)
    ref_q = divergence_score_ref(feats_q, pseudo_lbls, src_proto, src_proto_cov)
    ref_f = divergence_score_ref(feats, pseudo_lbls, src_proto, src_proto_cov)
    assert jnp.allclose(out, ref_q, rtol=1e-4, atol=1e-5), (out, ref_q)
    assert jnp.allclose(out, ref_f, rtol=5e-2, atol=1e-3), (out, ref_f)

    # ---- multi-tile test: 2 shards, ragged last tile (in-kernel row mask) --------------
    N2 = 200
    j1, j2 = jax.random.split(k1, 2)
    feats2 = jax.random.normal(j1, (N2, D), dtype=jnp.float32)
    lbls2 = jax.random.randint(j2, (N2,), 0, C, dtype=jnp.int32)
    out2 = jax.block_until_ready(
        divergence_score(feats2, lbls2, src_proto, src_proto_cov, tile_n=128))
    feats2_q = feats2.astype(jnp.bfloat16).astype(jnp.float32)
    ref2_q = divergence_score_ref(feats2_q, lbls2, src_proto, src_proto_cov)
    ref2_f = divergence_score_ref(feats2, lbls2, src_proto, src_proto_cov)
    assert jnp.allclose(out2, ref2_q, rtol=1e-4, atol=1e-5), (out2, ref2_q)
    assert jnp.allclose(out2, ref2_f, rtol=5e-2, atol=1e-3), (out2, ref2_f)

    # ---- odd tile count: exercises the clamped index map (fully out-of-range tail tile) -
    N3 = 300
    m1, m2 = jax.random.split(k2, 2)
    feats3 = jax.random.normal(m1, (N3, D), dtype=jnp.float32)
    lbls3 = jax.random.randint(m2, (N3,), 0, C, dtype=jnp.int32)
    out3 = jax.block_until_ready(
        divergence_score(feats3, lbls3, src_proto, src_proto_cov, tile_n=128))
    feats3_q = feats3.astype(jnp.bfloat16).astype(jnp.float32)
    ref3_q = divergence_score_ref(feats3_q, lbls3, src_proto, src_proto_cov)
    ref3_f = divergence_score_ref(feats3, lbls3, src_proto, src_proto_cov)
    assert jnp.allclose(out3, ref3_q, rtol=1e-4, atol=1e-5), (out3, ref3_q)
    assert jnp.allclose(out3, ref3_f, rtol=5e-2, atol=1e-3), (out3, ref3_f)

    print("KERNEL_OK")
</pallas_src>

<mosaic_0001>
module attributes {stable_mosaic.version = 11 : i64} {
  func.func @kernel(%arg0: i32, %arg1: i32, %arg2: memref<1x16xi32, #tpu.memory_space<vmem>>, %arg3: memref<16x32xf32, #tpu.memory_space<vmem>>, %arg4: memref<1x8x32xf32, #tpu.memory_space<vmem>>, %arg5: memref<1x8x1xf32, #tpu.memory_space<vmem>>, %arg6: memref<8x32xf32, #tpu.memory_space<vmem>>, %arg7: memref<8x1xf32, #tpu.memory_space<vmem>>) attributes {dimension_semantics = [#tpu.dimension_semantics<parallel>, #tpu.dimension_semantics<arbitrary>], iteration_bounds = array<i64: 1, 1>, scalar_prefetch = 0 : i64, scratch_operands = 2 : i64, tpu.core_type = #tpu.core_type<tc>, window_params = [{transform_indices = @transform_0, window_bounds = array<i64: 1, 16>}, {transform_indices = @transform_1, window_bounds = array<i64: 16, 32>}, {transform_indices = @transform_2, window_bounds = array<i64: 1, 8, 32>}, {transform_indices = @transform_3, window_bounds = array<i64: 1, 8, 1>}]} {
    %c0_i32 = arith.constant 0 : i32
    %0 = arith.cmpi eq, %arg1, %c0_i32 : i32
    %1 = arith.extui %0 : i1 to i32
    %c0_i32_0 = arith.constant 0 : i32
    %2 = arith.cmpi ne, %1, %c0_i32_0 : i32
    scf.if %2 {
      %cst_15 = arith.constant 0.000000e+00 : f32
      %26 = vector.broadcast %cst_15 : f32 to vector<8x32xf32>
      %c0_16 = arith.constant 0 : index
      %c0_17 = arith.constant 0 : index
      %27 = vector.load %arg6[%c0_16, %c0_17] : memref<8x32xf32, #tpu.memory_space<vmem>>, vector<8x32xf32>
      tpu.vector_store %arg6[%c0_16, %c0_17], %26 {strides = array<i32>} : memref<8x32xf32, #tpu.memory_space<vmem>>, vector<8x32xf32>,
      %cst_18 = arith.constant 0.000000e+00 : f32
      %28 = vector.broadcast %cst_18 : f32 to vector<8x1xf32>
      %c0_19 = arith.constant 0 : index
      %c0_20 = arith.constant 0 : index
      %29 = vector.load %arg7[%c0_19, %c0_20] : memref<8x1xf32, #tpu.memory_space<vmem>>, vector<8x1xf32>
      tpu.vector_store %arg7[%c0_19, %c0_20], %28 {strides = array<i32>} : memref<8x1xf32, #tpu.memory_space<vmem>>, vector<8x1xf32>,
    } else {
    }
    %c0 = arith.constant 0 : index
    %c0_1 = arith.constant 0 : index
    %3 = vector.load %arg2[%c0, %c0_1] : memref<1x16xi32, #tpu.memory_space<vmem>>, vector<1x16xi32>
    %c0_2 = arith.constant 0 : index
    %c0_3 = arith.constant 0 : index
    %4 = vector.load %arg3[%c0_2, %c0_3] : memref<16x32xf32, #tpu.memory_space<vmem>>, vector<16x32xf32>
    %5 = arith.truncf %4 : vector<16x32xf32> to vector<16x32xbf16>
    %6 = tpu.iota {dimensions = array<i32: 0>} : vector<8x16xi32>
    %7 = vector.broadcast %3 : vector<1x16xi32> to vector<8x16xi32>
    %8 = arith.cmpi eq, %6, %7 : vector<8x16xi32>
    %9 = arith.extui %8 : vector<8x16xi1> to vector<8x16xi32>
    %10 = arith.sitofp %9 : vector<8x16xi32> to vector<8x16xf32>
    %11 = arith.truncf %10 : vector<8x16xf32> to vector<8x16xbf16>
    %c0_4 = arith.constant 0 : index
    %c0_5 = arith.constant 0 : index
    %12 = vector.load %arg6[%c0_4, %c0_5] : memref<8x32xf32, #tpu.memory_space<vmem>>, vector<8x32xf32>
    %cst = arith.constant dense<0.000000e+00> : vector<8x32xf32>
    %13 = tpu.matmul %11, %5, %cst {dimension_numbers = #tpu.dot_dimension_numbers<[1], [0], [0], [1], [0, 0, 1, 1], [], []>} : vector<8x16xbf16>, vector<16x32xbf16>, vector<8x32xf32> -> vector<8x32xf32>
    %14 = arith.addf %12, %13 : vector<8x32xf32>
    %c0_6 = arith.constant 0 : index
    %c0_7 = arith.constant 0 : index
    %15 = vector.load %arg6[%c0_6, %c0_7] : memref<8x32xf32, #tpu.memory_space<vmem>>, vector<8x32xf32>
    tpu.vector_store %arg6[%c0_6, %c0_7], %14 {strides = array<i32>} : memref<8x32xf32, #tpu.memory_space<vmem>>, vector<8x32xf32>,
    %c0_8 = arith.constant 0 : index
    %c0_9 = arith.constant 0 : index
    %16 = vector.load %arg7[%c0_8, %c0_9] : memref<8x1xf32, #tpu.memory_space<vmem>>, vector<8x1xf32>
    %17 = arith.extui %8 : vector<8x16xi1> to vector<8x16xi32>
    %18 = arith.sitofp %17 : vector<8x16xi32> to vector<8x16xf32>
    %cst_10 = arith.constant dense<0.000000e+00> : vector<8xf32>
    %19 = vector.multi_reduction <add>, %18, %cst_10 [1] : vector<8x16xf32> to vector<8xf32>
    %20 = vector.shape_cast %19 : vector<8xf32> to vector<8x1xf32>
    %21 = arith.addf %16, %20 : vector<8x1xf32>
    %c0_11 = arith.constant 0 : index
    %c0_12 = arith.constant 0 : index
    %22 = vector.load %arg7[%c0_11, %c0_12] : memref<8x1xf32, #tpu.memory_space<vmem>>, vector<8x1xf32>
    tpu.vector_store %arg7[%c0_11, %c0_12], %21 {strides = array<i32>} : memref<8x1xf32, #tpu.memory_space<vmem>>, vector<8x1xf32>,
    %c0_i32_13 = arith.constant 0 : i32
    %23 = arith.cmpi eq, %arg1, %c0_i32_13 : i32
    %24 = arith.extui %23 : i1 to i32
    %c0_i32_14 = arith.constant 0 : i32
    %25 = arith.cmpi ne, %24, %c0_i32_14 : i32
    scf.if %25 {
      %c0_15 = arith.constant 0 : index
      %c0_16 = arith.constant 0 : index
      %26 = vector.load %arg6[%c0_15, %c0_16] : memref<8x32xf32, #tpu.memory_space<vmem>>, vector<8x32xf32>
      %c0_17 = arith.constant 0 : index
      %c0_18 = arith.constant 0 : index
      %c0_19 = arith.constant 0 : index
      %27 = vector.load %arg4[%c0_17, %c0_18, %c0_19] : memref<1x8x32xf32, #tpu.memory_space<vmem>>, vector<1x8x32xf32>
      %28 = vector.shape_cast %27 : vector<1x8x32xf32> to vector<8x32xf32>
      %29 = vector.shape_cast %26 : vector<8x32xf32> to vector<1x8x32xf32>
      tpu.vector_store %arg4[%c0_17, %c0_18, %c0_19], %29 {strides = array<i32>} : memref<1x8x32xf32, #tpu.memory_space<vmem>>, vector<1x8x32xf32>,
      %c0_20 = arith.constant 0 : index
      %c0_21 = arith.constant 0 : index
      %30 = vector.load %arg7[%c0_20, %c0_21] : memref<8x1xf32, #tpu.memory_space<vmem>>, vector<8x1xf32>
      %c0_22 = arith.constant 0 : index
      %c0_23 = arith.constant 0 : index
      %c0_24 = arith.constant 0 : index
      %31 = vector.load %arg5[%c0_22, %c0_23, %c0_24] : memref<1x8x1xf32, #tpu.memory_space<vmem>>, vector<1x8x1xf32>
      %32 = vector.shape_cast %31 : vector<1x8x1xf32> to vector<8x1xf32>
      %33 = vector.shape_cast %30 : vector<8x1xf32> to vector<1x8x1xf32>
      tpu.vector_store %arg5[%c0_22, %c0_23, %c0_24], %33 {strides = array<i32>} : memref<1x8x1xf32, #tpu.memory_space<vmem>>, vector<1x8x1xf32>,
    } else {
    }
    return
  }
  func.func @transform_0(%arg0: i32, %arg1: i32) -> (i32, i32) {
    %c1_i32 = arith.constant 1 : i32
    %0 = arith.muli %arg0, %c1_i32 : i32
    %1 = arith.addi %0, %arg1 : i32
    %c0_i32 = arith.constant 0 : i32
    %c0_i32_0 = arith.constant 0 : i32
    return %c0_i32, %1 : i32, i32
  }
  func.func @transform_1(%arg0: i32, %arg1: i32) -> (i32, i32) {
    %c1_i32 = arith.constant 1 : i32
    %0 = arith.muli %arg0, %c1_i32 : i32
    %1 = arith.addi %0, %arg1 : i32
    %c0_i32 = arith.constant 0 : i32
    %c0_i32_0 = arith.constant 0 : i32
    return %1, %c0_i32 : i32, i32
  }
  func.func @transform_2(%arg0: i32, %arg1: i32) -> (i32, i32, i32) {
    %c0_i32 = arith.constant 0 : i32
    %c0_i32_0 = arith.constant 0 : i32
    %c0_i32_1 = arith.constant 0 : i32
    return %arg0, %c0_i32, %c0_i32_0 : i32, i32, i32
  }
  func.func @transform_3(%arg0: i32, %arg1: i32) -> (i32, i32, i32) {
    %c0_i32 = arith.constant 0 : i32
    %c0_i32_0 = arith.constant 0 : i32
    %c0_i32_1 = arith.constant 0 : i32
    return %arg0, %c0_i32, %c0_i32_0 : i32, i32, i32
  }
}

</mosaic_0001>

<bundles_post_ra>
// kernel: tpu_custom_call.1
= control target key start
LH: loop header
LB: loop body
LE: loop exit
PB: predicated region body
PF: predicated region fallthrough
CT: control target
= control target key end

     0   :  { %9 = vsyncpa [#allocation5], 0  ;;  %s261_s0 = inlined_call_operand.hbm [shape: s32[1,16], index: 0, kind: input, shape index: {}]   ;;  %s262_s1 = inlined_call_operand.hbm [shape: f32[16,32], index: 1, kind: input, shape index: {}]   ;;  %s263_s2 = inlined_call_operand.hbm [shape: f32[1,8,32], index: 2, kind: output, shape index: {0}]   ;;  %s264_s3 = inlined_call_operand.vmem [shape: f32[1,8,1], index: 3, kind: output, shape index: {1}]  }
   0x1   :  { %10 = vsyncpa [#allocation8], 0 }
   0x2   :  { %11 = vsyncpa [#allocation6], 0  ;;  %s19_s14 = sshll.u32 %s261_s0, 4  ;;  %s217_s15 = smov [#allocation4]   ;;  %s20_s14 = int_to_ptr.hbm [resolvable:$true] %s19_s14 }
   0x3   :  { %s21_s16 = sshll.u32 %s217_s15, 4  ;;  %s33_s19 = sshll.u32 %s262_s1, 4  ;;  %s22_s16 = int_to_ptr.vmem [resolvable:$true] %s21_s16  ;;  %s34_s19 = int_to_ptr.hbm [resolvable:$true] %s33_s19 }
   0x4   :  { %24 = dma.hbm_to_vmem [thread:$0]  %s20_s14, 16, %s22_s16, [#allocation5]  }
   0x5   :  { %s218_s20 = smov [#allocation7]   ;;  %s219_s22 = smov 128  }
   0x6   :  { %s35_s21 = sshll.u32 %s218_s20, 4  ;;  %s220_s23 = smov 8   ;;  %s36_s21 = int_to_ptr.vmem [resolvable:$true] %s35_s21 }
   0x7   :  { %41 = dma.hbm_to_vmem [thread:$0]  %s34_s19, 256, %s36_s21, [#allocation8], %s219_s22, %s219_s22, %s220_s23  }
   0x8   :  { %211 = dma.done.wait [#allocation5], 16  }
   0x9   :  { %212 = vsyncadd [#allocation5], 4294967280 }
   0xa   :  { %213 = dma.done.wait [#allocation8], 256  }
   0xb   :  { %214 = vsyncadd [#allocation8], 4294967040  ;;  %vm60_vm0 = vcmask 7168   ;;  %v221_v0 = vmov 0.0   ;;  %vm58_vm1 = vcmask 261120   ;;  %v66_v1 = vlaneseq  ;;  %v63_v3 = vld [vmem:[#allocation7] sm:$0xff] }
   0xc   :  { %61 = vst.msk [vmem:[#allocation3] sm:$0xff] %vm60_vm0, %v221_v0  ;;  %v64_v4 = vld [vmem:[#allocation7 + $0x8] sm:$0xff]  ;;  %v138_v6 = vld [vmem:[#allocation4] ss:$0 sm:$0xff]  ;;  %vm74_vm3 = vcmask 130048   ;;  %s222_s24 = smov [#allocation9]  }
   0xd   :  { %59 = vst.msk [vmem:[#allocation2] sm:$0xff] %vm58_vm1, %v221_v0  ;;  %v67_v2 = vshrl.u32 %v66_v1, 7  ;;  %v65_v5 = vpack.c.bf16 %v64_v4, %v63_v3  ;;  %s113_s25 = sshll.u32 %s222_s24, 4  ;;  %s115_s28 = sshll.u32 %s263_s2, 4  ;;  %s114_s25 = int_to_ptr.vmem [resolvable:$true] %s113_s25  ;;  %s116_s28 = int_to_ptr.hbm [resolvable:$true] %s115_s28 }
   0xf   :  { %85 = vmatpush.bf16.msra.mxu0 %v65_v5  ;;  %vm69_vm2 = vcmp.eq.s32.totalorder %v67_v2, %v138_v6 }
  0x10   :  { %v130_v7 = vsel %vm69_vm2, 1.0, %v221_v0 }
  0x11   :  { %v72_v8 = vpack.c.bf16 %v130_v7, %v130_v7  ;;  %v95_v9 = vsel %vm74_vm3, %v130_v7, 0.0 }
  0x12   :  { %96 = vadd.xlane.f32.xlu0 %v95_v9 }
  0x13   :  { %131 = vmatmul.msk.bf16.vlgmr.msra.gmra.mxu0 %vm74_vm3, %v72_v8  ;;  %v94_v10 = vld [vmem:[#allocation3] sm:$0xff] }
  0x14   :  { %v73_v13 = vld [vmem:[#allocation2] sm:$0xff] }
  0x85   :  { %v97_v11 = vpop.xlane.xlu0 %96 }
  0x86   :  { %v98_v12 = vadd.f32 %v97_v11, %v94_v10 }
  0x88   :  { %100 = vst.msk [vmem:[#allocation3] sm:$0xff] %vm60_vm0, %v98_v12 }
  0x8f   :  { %v106_v14 = vld [vmem:[#allocation3] sm:$0xff] }
  0x90   :  { %v87_v15 = vpop.f32.mrf.mxu0  ;;  %107 = vst.msk [vmem:[%s264_s3] sm:$0xff] %vm60_vm0, %v106_v14 }
  0x91   :  { %v91_v16 = vadd.f32 %v87_v15, %v73_v13 }
  0x93   :  { %93 = vst.msk [vmem:[#allocation2] sm:$0xff] %vm58_vm1, %v91_v16 }
  0x98   :  { %v89_v17 = vpop.f32.mrf.mxu0 }
  0x9a   :  { %v104_v18 = vld [vmem:[#allocation2] sm:$0xff] }
  0x9b   :  { %105 = vst.msk [vmem:[#allocation9] sm:$0xff] %vm58_vm1, %v104_v18 }
  0x9c   :  { %118 = dma.vmem_to_hbm [thread:$0]  %s114_s25, 128, %s116_s28, [#allocation6]  }
  0x9d   :  { %215 = dma.done.wait [#allocation6], 128  }
  0x9e   :  { %216 = vsyncadd [#allocation6], 4294967168 }
  0x9f   :  { %127 = vsyncpa [#allocation5], 1 }
  0xa0   :  { %128 = vsyncpa [#allocation8], 1 }
  0xa1   :  { %129 = vsyncpa [#allocation6], 1 }

</bundles_post_ra>
